<compile_context>
chip_gen: v6e
topology: v6e:2x2x1
jax: 0.10.0
libtpu: 0.0.40
codegen_flags: <defaults>
</compile_context>

<pallas_src>
import functools

import jax
import jax.numpy as jnp
from jax.experimental import pallas as pl
from jax.experimental.pallas import tpu as pltpu


def _layernorm2d_kernel(x_ref, w_ref, b_ref, o_ref, *, eps):
    # x_ref: (blk_n, C, ts)   w_ref / b_ref: (1, C, 1) float32
    x = x_ref[...].astype(jnp.float32)
    mu = jnp.mean(x, axis=1, keepdims=True)            # mean over channels
    xc = x - mu
    var = jnp.mean(xc * xc, axis=1, keepdims=True)     # biased variance
    inv = jax.lax.rsqrt(var + eps)                     # (blk_n, 1, ts), EUP
    out = xc * (w_ref[...] * inv) + b_ref[...]         # fused affine
    o_ref[...] = out.astype(o_ref.dtype)


def _round_up(a, b):
    return (a + b - 1) // b * b


def _cdiv(a, b):
    return -(-a // b)


def _physical_vmem_bytes():
    try:
        return int(pltpu.get_tpu_info().vmem_capacity_bytes)
    except Exception:
        return 64 * 1024 * 1024  # conservative default (v7x per-core VMEM)


def _num_tensorcores():
    # Only used to decide whether manufacturing extra grid steps is worth it.
    try:
        dev = jax.devices()[0]
        kind = str(getattr(dev, "device_kind", "")).lower()
        if "v7" in kind:
            return 2
        nc = getattr(dev, "num_cores", None)
        if nc:
            return int(nc)
    except Exception:
        pass
    return 1


def layernorm2d(x, weight, bias, eps=1e-6):
    """x: (N, C, H, W); weight, bias: (C,). Matches LayerNormFunction.forward."""
    N, C, H, W = x.shape
    HW = H * W
    itemsize = jnp.dtype(x.dtype).itemsize

    phys_vmem = _physical_vmem_bytes()
    n_tc = _num_tensorcores()

    # Budget for the working set: tighter factor on 64 MiB (v7x) parts, looser
    # on 128 MiB (v5e/v6e) parts where fewer, fatter grid steps are free wins.
    budget = phys_vmem // 4 if phys_vmem <= 64 * 2 ** 20 else phys_vmem // 2

    def block_cost(bn, t):
        io = 4 * bn * C * t * itemsize      # 2x-buffered input + output blocks
        tmp = 3 * bn * C * t * 4            # fp32 intermediates inside the body
        return io + tmp

    hw_ceil = _round_up(HW, 128)

    # Fold the whole batch into one block when doing so still allows a
    # >= 512-lane spatial tile (amortizes the ~0.35us per-grid-step overhead).
    blk_n = N if block_cost(N, min(512, hw_ceil)) <= budget else 1

    # Largest lane-dense spatial tile under the VMEM budget.
    ts = 128
    for cand in (16384, 8192, 4096, 2048, 1024, 512, 256, 128):
        if cand <= hw_ceil and block_cost(blk_n, cand) <= budget:
            ts = cand
            break

    # Occupancy for multi-TensorCore chips only (v7x): split along the batch
    # axis first (keeps lane width / DMA contiguity maximal), then halve the
    # spatial tile but never below 512 lanes.  Single-TC chips (v5e/v6e) keep
    # the largest tile: extra grid steps there are purely serial overhead.
    if n_tc > 1:
        if (N // blk_n) * _cdiv(HW, ts) < n_tc and blk_n > 1:
            blk_n = 1
        while (N // blk_n) * _cdiv(HW, ts) < n_tc and ts > 512 and ts % 256 == 0:
            ts //= 2

    # If a single spatial block covers everything, make it exactly full-extent
    # (block dim == array dim), so no masking at all is needed.
    if _cdiv(HW, ts) == 1:
        ts = HW

    grid = (N // blk_n, _cdiv(HW, ts))

    x3 = x.reshape(N, C, HW)
    w3 = weight.astype(jnp.float32).reshape(1, C, 1)
    b3 = bias.astype(jnp.float32).reshape(1, C, 1)

    vmem_limit = int(max(16 * 2 ** 20,
                         min(phys_vmem - 8 * 2 ** 20,
                             block_cost(blk_n, ts) + 8 * 2 ** 20)))

    cost = pl.CostEstimate(
        flops=int(7 * N * C * HW),
        transcendentals=int(N * HW),
        bytes_accessed=int(2 * N * C * HW * itemsize + 2 * C * 4),
    )

    out3 = pl.pallas_call(
        functools.partial(_layernorm2d_kernel, eps=float(eps)),
        out_shape=jax.ShapeDtypeStruct((N, C, HW), x.dtype),
        grid_spec=pltpu.PrefetchScalarGridSpec(
            num_scalar_prefetch=0,
            grid=grid,
            in_specs=[
                pl.BlockSpec((blk_n, C, ts), lambda n, s: (n, 0, s)),
                pl.BlockSpec((1, C, 1), lambda n, s: (0, 0, 0)),
                pl.BlockSpec((1, C, 1), lambda n, s: (0, 0, 0)),
            ],
            out_specs=pl.BlockSpec((blk_n, C, ts), lambda n, s: (n, 0, s)),
        ),
        compiler_params=pltpu.CompilerParams(
            dimension_semantics=("parallel", "parallel"),
            vmem_limit_bytes=vmem_limit,
        ),
        cost_estimate=cost,
    )(x3, w3, b3)

    return out3.reshape(N, C, H, W)


def layernorm2d_ref(x, weight, bias, eps=1e-6):
    # Pure-JAX reference mirroring the PyTorch LayerNormFunction.forward.
    mu = jnp.mean(x, axis=1, keepdims=True)
    var = jnp.mean((x - mu) ** 2, axis=1, keepdims=True)
    y = (x - mu) / jnp.sqrt(var + eps)
    C = x.shape[1]
    return weight.reshape(1, C, 1, 1) * y + bias.reshape(1, C, 1, 1)


if __name__ == "__main__":
    key = jax.random.PRNGKey(0)

    # Small shapes consistent with the module: batch=2, channels=4, 16x16.
    N, C, H, W = 2, 4, 16, 16
    x = jax.random.normal(key, (N, C, H, W), dtype=jnp.float32)
    # Deterministic parameter init, matching nn.Parameter(torch.ones/zeros(C)).
    weight = jnp.ones((C,), dtype=jnp.float32)
    bias = jnp.zeros((C,), dtype=jnp.float32)

    out = jax.block_until_ready(layernorm2d(x, weight, bias, eps=1e-6))
    ref = layernorm2d_ref(x, weight, bias, eps=1e-6)
    assert out.shape == (N, C, H, W)
    assert jnp.allclose(out, ref, atol=1e-5, rtol=1e-5)

    # Single full-extent block path (H*W < 128, not a multiple of 128),
    # with non-trivial affine params.
    x2 = jax.random.normal(jax.random.PRNGKey(0), (2, 4, 9, 9), dtype=jnp.float32)
    w2 = jnp.full((4,), 0.5, dtype=jnp.float32)
    b2 = jnp.full((4,), 0.25, dtype=jnp.float32)
    out2 = jax.block_until_ready(layernorm2d(x2, w2, b2, eps=1e-6))
    ref2 = layernorm2d_ref(x2, w2, b2, eps=1e-6)
    assert out2.shape == x2.shape
    assert jnp.allclose(out2, ref2, atol=1e-5, rtol=1e-5)

    # Masked-boundary-block path (H*W = 576: multiple of 128 tiles don't divide).
    x3 = jax.random.normal(jax.random.PRNGKey(1), (2, 4, 24, 24), dtype=jnp.float32)
    out3 = jax.block_until_ready(layernorm2d(x3, w2, b2, eps=1e-6))
    ref3 = layernorm2d_ref(x3, w2, b2, eps=1e-6)
    assert out3.shape == x3.shape
    assert jnp.allclose(out3, ref3, atol=1e-5, rtol=1e-5)

    print("KERNEL_OK")
</pallas_src>

<mosaic_0001>
module attributes {stable_mosaic.version = 11 : i64} {
  func.func @_layernorm2d_kernel(%arg0: i32, %arg1: i32, %arg2: memref<2x4x256xf32, #tpu.memory_space<vmem>>, %arg3: memref<1x4x1xf32, #tpu.memory_space<vmem>>, %arg4: memref<1x4x1xf32, #tpu.memory_space<vmem>>, %arg5: memref<2x4x256xf32, #tpu.memory_space<vmem>>) attributes {dimension_semantics = [#tpu.dimension_semantics<parallel>, #tpu.dimension_semantics<parallel>], iteration_bounds = array<i64: 1, 1>, scalar_prefetch = 0 : i64, scratch_operands = 0 : i64, tpu.core_type = #tpu.core_type<tc>, window_params = [{transform_indices = @transform_0, window_bounds = array<i64: 2, 4, 256>}, {pipeline_mode = #tpu.pipeline_mode<synchronous>, transform_indices = @transform_1, window_bounds = array<i64: 1, 4, 1>}, {pipeline_mode = #tpu.pipeline_mode<synchronous>, transform_indices = @transform_2, window_bounds = array<i64: 1, 4, 1>}, {transform_indices = @transform_3, window_bounds = array<i64: 2, 4, 256>}]} {
    %c0 = arith.constant 0 : index
    %c0_0 = arith.constant 0 : index
    %c0_1 = arith.constant 0 : index
    %0 = vector.load %arg2[%c0, %c0_0, %c0_1] : memref<2x4x256xf32, #tpu.memory_space<vmem>>, vector<2x4x256xf32>
    %cst = arith.constant dense<0.000000e+00> : vector<2x256xf32>
    %1 = vector.multi_reduction <add>, %0, %cst [1] : vector<2x4x256xf32> to vector<2x256xf32>
    %2 = vector.shape_cast %1 : vector<2x256xf32> to vector<2x1x256xf32>
    %cst_2 = arith.constant 4.000000e+00 : f32
    %3 = vector.broadcast %cst_2 : f32 to vector<2x1x256xf32>
    %4 = arith.divf %2, %3 : vector<2x1x256xf32>
    %5 = vector.broadcast %4 : vector<2x1x256xf32> to vector<2x4x256xf32>
    %6 = arith.subf %0, %5 : vector<2x4x256xf32>
    %7 = arith.mulf %6, %6 : vector<2x4x256xf32>
    %cst_3 = arith.constant dense<0.000000e+00> : vector<2x256xf32>
    %8 = vector.multi_reduction <add>, %7, %cst_3 [1] : vector<2x4x256xf32> to vector<2x256xf32>
    %9 = vector.shape_cast %8 : vector<2x256xf32> to vector<2x1x256xf32>
    %cst_4 = arith.constant 4.000000e+00 : f32
    %10 = vector.broadcast %cst_4 : f32 to vector<2x1x256xf32>
    %11 = arith.divf %9, %10 : vector<2x1x256xf32>
    %cst_5 = arith.constant 9.99999997E-7 : f32
    %12 = vector.broadcast %cst_5 : f32 to vector<2x1x256xf32>
    %13 = arith.addf %11, %12 : vector<2x1x256xf32>
    %14 = math.rsqrt %13 : vector<2x1x256xf32>
    %c0_6 = arith.constant 0 : index
    %c0_7 = arith.constant 0 : index
    %c0_8 = arith.constant 0 : index
    %15 = vector.load %arg3[%c0_6, %c0_7, %c0_8] : memref<1x4x1xf32, #tpu.memory_space<vmem>>, vector<1x4x1xf32>
    %16 = vector.broadcast %15 : vector<1x4x1xf32> to vector<2x4x256xf32>
    %17 = vector.broadcast %14 : vector<2x1x256xf32> to vector<2x4x256xf32>
    %18 = arith.mulf %16, %17 : vector<2x4x256xf32>
    %19 = arith.mulf %6, %18 : vector<2x4x256xf32>
    %c0_9 = arith.constant 0 : index
    %c0_10 = arith.constant 0 : index
    %c0_11 = arith.constant 0 : index
    %20 = vector.load %arg4[%c0_9, %c0_10, %c0_11] : memref<1x4x1xf32, #tpu.memory_space<vmem>>, vector<1x4x1xf32>
    %21 = vector.broadcast %20 : vector<1x4x1xf32> to vector<2x4x256xf32>
    %22 = arith.addf %19, %21 : vector<2x4x256xf32>
    %c0_12 = arith.constant 0 : index
    %c0_13 = arith.constant 0 : index
    %c0_14 = arith.constant 0 : index
    %23 = vector.load %arg5[%c0_12, %c0_13, %c0_14] : memref<2x4x256xf32, #tpu.memory_space<vmem>>, vector<2x4x256xf32>
    tpu.vector_store %arg5[%c0_12, %c0_13, %c0_14], %22 {strides = array<i32>} : memref<2x4x256xf32, #tpu.memory_space<vmem>>, vector<2x4x256xf32>,
    return
  }
  func.func @transform_0(%arg0: i32, %arg1: i32) -> (i32, i32, i32) {
    %c0_i32 = arith.constant 0 : i32
    %c0_i32_0 = arith.constant 0 : i32
    return %arg0, %c0_i32, %arg1 : i32, i32, i32
  }
  func.func @transform_1(%arg0: i32, %arg1: i32) -> (i32, i32, i32) {
    %c0_i32 = arith.constant 0 : i32
    %c0_i32_0 = arith.constant 0 : i32
    %c0_i32_1 = arith.constant 0 : i32
    %c0_i32_2 = arith.constant 0 : i32
    return %c0_i32, %c0_i32_0, %c0_i32_1 : i32, i32, i32
  }
  func.func @transform_2(%arg0: i32, %arg1: i32) -> (i32, i32, i32) {
    %c0_i32 = arith.constant 0 : i32
    %c0_i32_0 = arith.constant 0 : i32
    %c0_i32_1 = arith.constant 0 : i32
    %c0_i32_2 = arith.constant 0 : i32
    return %c0_i32, %c0_i32_0, %c0_i32_1 : i32, i32, i32
  }
  func.func @transform_3(%arg0: i32, %arg1: i32) -> (i32, i32, i32) {
    %c0_i32 = arith.constant 0 : i32
    %c0_i32_0 = arith.constant 0 : i32
    return %arg0, %c0_i32, %arg1 : i32, i32, i32
  }
}

</mosaic_0001>

<bundles_post_ra>
// kernel: tpu_custom_call.1
= control target key start
LH: loop header
LB: loop body
LE: loop exit
PB: predicated region body
PF: predicated region fallthrough
CT: control target
= control target key end

     0   :  { %8 = vsyncpa [#allocation3], 0  ;;  %s306_s0 = inlined_call_operand.hbm [shape: f32[2,4,256], index: 0, kind: input, shape index: {}]   ;;  %s307_s1 = inlined_call_operand.vmem [shape: f32[1,4,1], index: 1, kind: input, shape index: {}]   ;;  %s308_s2 = inlined_call_operand.vmem [shape: f32[1,4,1], index: 2, kind: input, shape index: {}]   ;;  %s309_s3 = inlined_call_operand.hbm [shape: f32[2,4,256], index: 3, kind: output, shape index: {}]  }
   0x1   :  { %9 = vsyncpa [#allocation4], 0  ;;  %s244_s12 = smov [#allocation2]  }
   0x2   :  { %s15_s13 = sshll.u32 %s244_s12, 4  ;;  %s16_s13 = int_to_ptr.vmem [resolvable:$true] %s15_s13 }
   0x3   :  { %s208_s14 = scalar_lea.vmem %s16_s13, 256  ;;  %p213_p1 = scmp.lt.s32.totalorder %s16_s13, %s16_s13 }
   0x4   :  { %p209_p0 = scmp.ne.s32.totalorder %s16_s13, %s208_s14  ;;  %p214_p2 = scmp.lt.s32.totalorder %s208_s14, %s208_s14 }
   0x6   :  { %p215_p3 = por %p214_p2, %p213_p1 }
   0x8   :  { %p216_p4 = pnand %p215_p3, %p209_p0 }
   0xa   :  { %219 = shalt.err (!%p216_p4)
}
   0xb   :  { %s245_s15 = smov 128   ;;  %s246_s16 = smov 8  }
   0xc   :  { %21 = dma.hbm_to_vmem [thread:$0]  %s306_s0, 256, %s16_s13, [#allocation3], %s245_s15, %s245_s15, %s246_s16  }
   0xd   :  { %240 = dma.done.wait [#allocation3], 256  }
   0xe   :  { %241 = vsyncadd [#allocation3], 4294967040  ;;  %v247_v0 = vmov 0   ;;  %v129_v1 = vld [vmem:[%s307_s1] sm:$0xf]  ;;  %v30_v4 = vld [vmem:[#allocation2 + $0x8] sm:$0xff] }
   0xf   :  { %189 = vset.pattern.permute.xlu0 %v247_v0  ;;  %v149_v2 = vld [vmem:[%s308_s2] sm:$0xf]  ;;  %vm37_vm0 = vcmask 1043456   ;;  %v34_v6 = vcombine.high %v30_v4, %v30_v4  ;;  %s249_s0 = smov [#allocation5]  }
  0x10   :  { %132 = vperm.xlu0 %189, %v129_v1   ;;  %v29_v3 = vld [vmem:[#allocation2] sm:$0xff]  ;;  %v52_v9 = vsel %vm37_vm0, %v30_v4, 0.0  ;;  %s171_s1 = sshll.u32 %s249_s0, 4  ;;  %s172_s1 = int_to_ptr.vmem [resolvable:$true] %s171_s1 }
  0x11   :  { %v33_v5 = vcombine.high %v29_v3, %v29_v3  ;;  %v38_v7 = vsel %vm37_vm0, %v29_v3, 0.0  ;;  %v59_v10 = vsel %vm37_vm0, %v34_v6, 0.0  ;;  %v53_v13 = vrot.slane %v52_v9, 4  ;;  %s220_s2 = scalar_lea.vmem %s172_s1, 256  ;;  %p225_p6 = scmp.lt.s32.totalorder %s172_s1, %s172_s1 }
  0x12   :  { %v39_v11 = vrot.slane %v38_v7, 4  ;;  %v60_v14 = vrot.slane %v59_v10, 4  ;;  %p221_p5 = scmp.ne.s32.totalorder %s172_s1, %s220_s2  ;;  %p226_p7 = scmp.lt.s32.totalorder %s220_s2, %s220_s2 }
  0x13   :  { %v45_v8 = vsel %vm37_vm0, %v33_v5, 0.0  ;;  %v54_v17 = vadd.f32 %v53_v13, %v52_v9 }
  0x14   :  { %152 = vperm.xlu0 %189, %v149_v2   ;;  %v46_v12 = vrot.slane %v45_v8, 4  ;;  %v40_v15 = vadd.f32 %v39_v11, %v38_v7  ;;  %v61_v18 = vadd.f32 %v60_v14, %v59_v10  ;;  %p227_p8 = por %p226_p7, %p225_p6 }
  0x15   :  { %v55_v21 = vrot.slane %v54_v17, 2 }
  0x16   :  { %v47_v16 = vadd.f32 %v46_v12, %v45_v8  ;;  %v41_v19 = vrot.slane %v40_v15, 2  ;;  %v62_v22 = vrot.slane %v61_v18, 2  ;;  %p228_p9 = pnand %p227_p8, %p221_p5 }
  0x17   :  { %v56_v25 = vadd.f32 %v55_v21, %v54_v17  ;;  %v157_v21 = vlaneseq }
  0x18   :  { %v48_v20 = vrot.slane %v47_v16, 2  ;;  %v42_v23 = vadd.f32 %v41_v19, %v40_v15  ;;  %v63_v26 = vadd.f32 %v62_v22, %v61_v18  ;;  %v248_v19 = vmov 839922192  }
  0x19   :  { %v57_v29 = vrot.slane %v56_v25, 1 }
  0x1a   :  { %v49_v24 = vadd.f32 %v48_v20, %v47_v16  ;;  %v43_v27 = vrot.slane %v42_v23, 1  ;;  %v64_v30 = vrot.slane %v63_v26, 1  ;;  %v155_v20 = vunpack.c.l.s4 %v248_v19 }
  0x1b   :  { %v58_v33 = vadd.f32 %v57_v29, %v56_v25  ;;  %v158_v25 = vshrl.u32 %v157_v21, 7 }
  0x1c   :  { %v50_v28 = vrot.slane %v49_v24, 1  ;;  %v44_v31 = vadd.f32 %v43_v27, %v42_v23  ;;  %v65_v34 = vadd.f32 %v64_v30, %v63_v26 }
  0x1d   :  { %v69_v37 = vmul.f32 0.25, %v58_v33 }
  0x1e   :  { %v51_v32 = vadd.f32 %v50_v28, %v49_v24  ;;  %v67_v35 = vmul.f32 0.25, %v44_v31  ;;  %v70_v38 = vmul.f32 0.25, %v65_v34  ;;  %v156_v24 = vunpack.c.0.s8 %v155_v20 }
  0x20   :  { %v68_v36 = vmul.f32 0.25, %v51_v32  ;;  %v76_v40 = vcombine.low %v69_v37, %v70_v38  ;;  %v159_v29 = vsub.s32 %v156_v24, %v158_v25 }
  0x22   :  { %v75_v39 = vcombine.low %v67_v35, %v68_v36  ;;  %v288_v42 = vsub.f32 %v30_v4, %v76_v40 }
  0x24   :  { %v286_v41 = vsub.f32 %v29_v3, %v75_v39  ;;  %v82_v44 = vmul.f32 %v288_v42, %v288_v42 }
  0x26   :  { %v81_v43 = vmul.f32 %v286_v41, %v286_v41  ;;  %v86_v46 = vcombine.high %v82_v44, %v82_v44  ;;  %v103_v48 = vsel %vm37_vm0, %v82_v44, 0.0 }
  0x27   :  { %v104_v52 = vrot.slane %v103_v48, 4 }
  0x28   :  { %v85_v45 = vcombine.high %v81_v43, %v81_v43  ;;  %v89_v47 = vsel %vm37_vm0, %v81_v43, 0.0  ;;  %v110_v51 = vsel %vm37_vm0, %v86_v46, 0.0 }
  0x29   :  { %v90_v50 = vrot.slane %v89_v47, 4  ;;  %v111_v54 = vrot.slane %v110_v51, 4  ;;  %v105_v56 = vadd.f32 %v104_v52, %v103_v48 }
  0x2a   :  { %v96_v49 = vsel %vm37_vm0, %v85_v45, 0.0 }
  0x2b   :  { %v97_v53 = vrot.slane %v96_v49, 4  ;;  %v91_v55 = vadd.f32 %v90_v50, %v89_v47  ;;  %v112_v58 = vadd.f32 %v111_v54, %v110_v51  ;;  %v106_v60 = vrot.slane %v105_v56, 2 }
  0x2d   :  { %v98_v57 = vadd.f32 %v97_v53, %v96_v49  ;;  %v92_v59 = vrot.slane %v91_v55, 2  ;;  %v113_v62 = vrot.slane %v112_v58, 2  ;;  %v107_v0 = vadd.f32 %v106_v60, %v105_v56 }
  0x2f   :  { %v99_v61 = vrot.slane %v98_v57, 2  ;;  %v93_v63 = vadd.f32 %v92_v59, %v91_v55  ;;  %v114_v2 = vadd.f32 %v113_v62, %v112_v58  ;;  %v108_v4 = vrot.slane %v107_v0, 1 }
  0x31   :  { %v100_v1 = vadd.f32 %v99_v61, %v98_v57  ;;  %v94_v3 = vrot.slane %v93_v63, 1  ;;  %v115_v6 = vrot.slane %v114_v2, 1  ;;  %v109_v8 = vadd.f32 %v108_v4, %v107_v0 }
  0x33   :  { %v101_v5 = vrot.slane %v100_v1, 1  ;;  %v95_v7 = vadd.f32 %v94_v3, %v93_v63  ;;  %v116_v10 = vadd.f32 %v115_v6, %v114_v2  ;;  %v119_v12 = vmul.f32 0.25, %v109_v8 }
  0x35   :  { %v102_v9 = vadd.f32 %v101_v5, %v100_v1  ;;  %v117_v11 = vmul.f32 0.25, %v95_v7  ;;  %v120_v14 = vmul.f32 0.25, %v116_v10  ;;  %v123_v16 = vadd.f32 1e-06, %v119_v12 }
  0x37   :  { %v118_v13 = vmul.f32 0.25, %v102_v9  ;;  %v121_v15 = vadd.f32 1e-06, %v117_v11  ;;  %v124_v18 = vadd.f32 1e-06, %v120_v14 }
  0x39   :  { %v122_v17 = vadd.f32 1e-06, %v118_v13  ;;  %192 = vrsqrt.f32 %v121_v15 }
  0x3a   :  { %194 = vrsqrt.f32 %v123_v16 }
  0x3b   :  { %196 = vrsqrt.f32 %v122_v17 }
  0x3c   :  { %198 = vrsqrt.f32 %v124_v18 }
  0x46   :  { %v193_v22 = vpop.eup %192 }
  0x47   :  { %v195_v23 = vpop.eup %194 }
  0x48   :  { %v197_v26 = vpop.eup %196 }
  0x49   :  { %v199_v27 = vpop.eup %198 }
  0x8b   :  { %v133_v28 = vpop.permute.xlu0 %132 }
  0x8c   :  { %v135_v30 = vmul.f32 %v193_v22, %v133_v28  ;;  %v136_v31 = vmul.f32 %v197_v26, %v133_v28  ;;  %v137_v32 = vmul.f32 %v195_v23, %v133_v28  ;;  %v138_v33 = vmul.f32 %v199_v27, %v133_v28 }
  0x8e   :  { %v143_v34 = vcombine.low %v135_v30, %v136_v31  ;;  %v144_v35 = vcombine.low %v137_v32, %v138_v33 }
  0x8f   :  { %v153_v36 = vpop.permute.xlu0 %152 }
  0x90   :  { %v147_v37 = vmul.f32 %v143_v34, %v286_v41  ;;  %v148_v38 = vmul.f32 %v144_v35, %v288_v42  ;;  %v160_v39 = vrot.slane %v153_v36, %v159_v29 }
  0x92   :  { %v162_v40 = vadd.f32 %v160_v39, %v147_v37  ;;  %v163_v43 = vadd.f32 %v160_v39, %v148_v38 }
  0x94   :  { %164 = vst [vmem:[#allocation5] sm:$0xff] %v162_v40  ;;  %165 = vst [vmem:[#allocation5 + $0x8] sm:$0xff] %v163_v43 }
  0x95   :  { %231 = shalt.err (!%p228_p9)
}
  0x96   :  { %177 = dma.vmem_to_hbm [thread:$0]  %s172_s1, 256, %s309_s3, [#allocation4], %s245_s15, %s245_s15, %s246_s16  }
  0x97   :  { %242 = dma.done.wait [#allocation4], 256  }
  0x98   :  { %243 = vsyncadd [#allocation4], 4294967040 }
  0x99   :  { %181 = vsyncpa [#allocation3], 1 }
  0x9a   :  { %182 = vsyncpa [#allocation4], 1 }

</bundles_post_ra>
